<compile_context>
chip_gen: v5e
topology: v5e:2x2
jax: 0.10.0
libtpu: 0.0.40
codegen_flags: <defaults>
</compile_context>

<pallas_src>
import jax
import jax.numpy as jnp
from jax.experimental import pallas as pl
from jax.experimental.pallas import tpu as pltpu


_LANES = 128
# Per-buffer block target (bytes) for the tiled path: 2 MiB.
_BLOCK_BYTES = 2 * 1024 * 1024
# Tensors with at most this many elements take the single-block (no grid)
# path; anything larger gets a pipelined >= 2-step grid so in/out DMA overlap.
_SMALL_ELEMS = 128 * 1024


def _round_up(a: int, b: int) -> int:
    return ((a + b - 1) // b) * b


def _sublane_pack(dtype) -> int:
    """Minimum sublane multiple for this dtype: 8 (f32), 16 (bf16), 32 (i8/fp8)."""
    itemsize = jnp.dtype(dtype).itemsize
    return max(8, 8 * (4 // max(1, itemsize)))


def _cost(n: int, itemsize: int) -> pl.CostEstimate:
    return pl.CostEstimate(flops=3 * n, transcendentals=n,
                           bytes_accessed=2 * n * itemsize)


def _make_activation_kernel(vmf_kappa: float, threshold: float):
    """Kernel closure with the (static) hyperparameters baked in."""

    def kernel(x_ref, o_ref):
        x = x_ref[...]
        kappa = jnp.asarray(vmf_kappa, dtype=x.dtype)
        thr = jnp.asarray(threshold, dtype=x.dtype)
        # Exact PyTorch formula: exp on the EUP, cmp/cast/mul on the VPU,
        # all hidden under the HBM streams of this mem-bound kernel.
        o_ref[...] = jnp.exp(kappa * x) * (x > thr).astype(x.dtype)

    return kernel


def _tiled_call(x2d: jax.Array, kernel, block_bytes: int) -> jax.Array:
    """Pipelined elementwise pass over a lane-dense (rows, 128) slab."""
    rows, lanes = x2d.shape
    itemsize = jnp.dtype(x2d.dtype).itemsize
    s = _sublane_pack(x2d.dtype)

    # Cap block rows so one block is ~block_bytes (dtype-aware), never larger
    # than the (sublane-rounded) array.
    cap = max(s, (block_bytes // (lanes * itemsize)) // s * s)
    cap = min(cap, _round_up(rows, s))
    # Aim for an even number of grid steps so both v7x TensorCores sharing the
    # "parallel" axis get balanced work.
    num_pairs = pl.cdiv(rows, 2 * cap)                      # >= 1
    block_rows = max(s, _round_up(pl.cdiv(rows, 2 * num_pairs), s))
    block_rows = min(block_rows, _round_up(rows, s))
    grid = (pl.cdiv(rows, block_rows),)                     # ragged last block masked

    return pl.pallas_call(
        kernel,
        out_shape=jax.ShapeDtypeStruct((rows, lanes), x2d.dtype),
        grid_spec=pltpu.PrefetchScalarGridSpec(
            num_scalar_prefetch=0,
            grid=grid,
            in_specs=[pl.BlockSpec((block_rows, lanes), lambda i: (i, 0))],
            out_specs=pl.BlockSpec((block_rows, lanes), lambda i: (i, 0)),
        ),
        compiler_params=pltpu.CompilerParams(
            dimension_semantics=("parallel",)),
        cost_estimate=_cost(rows * lanes, itemsize),
    )(x2d)


def activation_layer(x: jax.Array,
                     vmf_kappa: float,
                     threshold: float = 0.0,
                     *,
                     block_bytes: int = _BLOCK_BYTES,
                     small_elems: int = _SMALL_ELEMS) -> jax.Array:
    """Pallas implementation of ActivationLayer.forward (any input shape)."""
    orig_shape = x.shape
    dtype = x.dtype
    n = x.size
    if n == 0:
        return jnp.zeros(orig_shape, dtype)

    itemsize = jnp.dtype(dtype).itemsize
    kernel = _make_activation_kernel(float(vmf_kappa), float(threshold))

    # ---- small path: whole array as a single VMEM block (no grid / reshape).
    if n <= small_elems:
        return pl.pallas_call(
            kernel,
            out_shape=jax.ShapeDtypeStruct(orig_shape, dtype),
            cost_estimate=_cost(n, itemsize),
        )(x)

    x_flat = jnp.reshape(x, (-1,))          # contiguous reshape: free

    # ---- common case: size is a multiple of 128 -> zero-copy tiled slab.
    if n % _LANES == 0:
        out2d = _tiled_call(jnp.reshape(x_flat, (n // _LANES, _LANES)),
                            kernel, block_bytes)
        return jnp.reshape(out2d, orig_shape)

    # ---- rare case: large tensor, size not a multiple of 128.
    # 128-aligned prefix through the tiled path; <128-element tail through a
    # tiny single-block call; concatenate.  Only this shape class pays the
    # extra HBM traffic of the prefix slice / concat.
    aligned_n = (n // _LANES) * _LANES
    prefix2d = jnp.reshape(x_flat[:aligned_n], (aligned_n // _LANES, _LANES))
    out_prefix = jnp.reshape(_tiled_call(prefix2d, kernel, block_bytes), (-1,))
    tail = jnp.reshape(x_flat[aligned_n:], (1, n - aligned_n))
    out_tail = jnp.reshape(
        pl.pallas_call(
            kernel,
            out_shape=jax.ShapeDtypeStruct(tail.shape, dtype),
            cost_estimate=_cost(n - aligned_n, itemsize),
        )(tail),
        (-1,),
    )
    return jnp.reshape(jnp.concatenate([out_prefix, out_tail]), orig_shape)


def activation_layer_ref(x, vmf_kappa, threshold=0.0):
    """Pure-JAX reference matching the PyTorch forward."""
    return jnp.exp(vmf_kappa * x) * (x > threshold).astype(x.dtype)


if __name__ == "__main__":
    key = jax.random.PRNGKey(0)
    vMF_kappa = 30.0
    threshold = 0.0

    # 1) Small NCHW activation (module's typical input) -> single-block path.
    B, C, H, W = 2, 4, 16, 16
    x = jax.random.normal(key, (B, C, H, W), dtype=jnp.float32)
    out = jax.block_until_ready(activation_layer(x, vMF_kappa, threshold))
    ref = activation_layer_ref(x, vMF_kappa, threshold)
    assert out.shape == x.shape and out.dtype == x.dtype
    assert jnp.allclose(out, ref, rtol=1e-5, atol=1e-5), "small-path mismatch"

    # 2) Aligned tiled path (force it with small_elems=0): size % 128 == 0,
    #    even 2-step grid, no padding/slicing anywhere.
    k2 = jax.random.PRNGKey(1)
    x2 = jax.random.normal(k2, (2, 4, 16, 32), dtype=jnp.float32)
    out2 = jax.block_until_ready(
        activation_layer(x2, vMF_kappa, threshold, small_elems=0))
    ref2 = activation_layer_ref(x2, vMF_kappa, threshold)
    assert jnp.allclose(out2, ref2, rtol=1e-5, atol=1e-5), "tiled-path mismatch"

    # 3) Aligned tiled path with a sublane-ragged final block (rows=36 -> blocks
    #    of 24 and 12 rows, the 12-row block is masked).
    k3 = jax.random.PRNGKey(2)
    x3 = jax.random.normal(k3, (36, 128), dtype=jnp.float32)
    out3 = jax.block_until_ready(
        activation_layer(x3, vMF_kappa, threshold, small_elems=0))
    ref3 = activation_layer_ref(x3, vMF_kappa, threshold)
    assert jnp.allclose(out3, ref3, rtol=1e-5, atol=1e-5), "ragged-block mismatch"

    # 4) Misaligned size (not a multiple of 128): prefix + tail path.
    k4 = jax.random.PRNGKey(3)
    x4 = jax.random.normal(k4, (3, 5, 17, 19), dtype=jnp.float32)
    out4 = jax.block_until_ready(
        activation_layer(x4, vMF_kappa, threshold, small_elems=0))
    ref4 = activation_layer_ref(x4, vMF_kappa, threshold)
    assert out4.shape == x4.shape and out4.dtype == x4.dtype
    assert jnp.allclose(out4, ref4, rtol=1e-5, atol=1e-5), "misaligned mismatch"

    # 5) bf16 dtype handling (16-row sublane packing path) with moderate kappa.
    k5 = jax.random.PRNGKey(4)
    x5 = jax.random.normal(k5, (2, 4, 16, 16), dtype=jnp.bfloat16)
    out5 = jax.block_until_ready(activation_layer(x5, 2.0, threshold))
    ref5 = activation_layer_ref(x5, 2.0, threshold)
    assert out5.dtype == jnp.bfloat16
    assert jnp.allclose(out5.astype(jnp.float32), ref5.astype(jnp.float32),
                        rtol=5e-2, atol=5e-2), "bf16 mismatch"

    print("KERNEL_OK")
</pallas_src>

<mosaic_0001>
module attributes {stable_mosaic.version = 11 : i64} {
  func.func @kernel(%arg0: memref<2x4x16x16xf32, #tpu.memory_space<vmem>>, %arg1: memref<2x4x16x16xf32, #tpu.memory_space<vmem>>) attributes {dimension_semantics = [], scalar_prefetch = 0 : i64, scratch_operands = 0 : i64, tpu.core_type = #tpu.core_type<tc>} {
    %c0 = arith.constant 0 : index
    %c0_0 = arith.constant 0 : index
    %c0_1 = arith.constant 0 : index
    %c0_2 = arith.constant 0 : index
    %0 = vector.load %arg0[%c0, %c0_0, %c0_1, %c0_2] : memref<2x4x16x16xf32, #tpu.memory_space<vmem>>, vector<2x4x16x16xf32>
    %cst = arith.constant 3.000000e+01 : f32
    %1 = vector.broadcast %cst : f32 to vector<2x4x16x16xf32>
    %2 = arith.mulf %1, %0 : vector<2x4x16x16xf32>
    %3 = math.exp %2 : vector<2x4x16x16xf32>
    %cst_3 = arith.constant 0.000000e+00 : f32
    %4 = vector.broadcast %cst_3 : f32 to vector<2x4x16x16xf32>
    %5 = arith.cmpf ogt, %0, %4 : vector<2x4x16x16xf32>
    %6 = arith.extui %5 : vector<2x4x16x16xi1> to vector<2x4x16x16xi32>
    %7 = arith.sitofp %6 : vector<2x4x16x16xi32> to vector<2x4x16x16xf32>
    %8 = arith.mulf %3, %7 : vector<2x4x16x16xf32>
    %c0_4 = arith.constant 0 : index
    %c0_5 = arith.constant 0 : index
    %c0_6 = arith.constant 0 : index
    %c0_7 = arith.constant 0 : index
    %9 = vector.load %arg1[%c0_4, %c0_5, %c0_6, %c0_7] : memref<2x4x16x16xf32, #tpu.memory_space<vmem>>, vector<2x4x16x16xf32>
    tpu.vector_store %arg1[%c0_4, %c0_5, %c0_6, %c0_7], %8 {strides = array<i32>} : memref<2x4x16x16xf32, #tpu.memory_space<vmem>>, vector<2x4x16x16xf32>,
    return
  }
}

</mosaic_0001>

<bundles_post_ra>
// kernel: tpu_custom_call.1
= control target key start
LH: loop header
LB: loop body
LE: loop exit
PB: predicated region body
PF: predicated region fallthrough
CT: control target
= control target key end

     0   :  { %6 = vsyncpa [#allocation3], 0  ;;  %s375_s0 = inlined_call_operand.hbm [shape: f32[2,4,16,16], index: 0, kind: input, shape index: {}]   ;;  %s376_s1 = inlined_call_operand.hbm [shape: f32[2,4,16,16], index: 1, kind: output, shape index: {}]  }
   0x1   :  { %7 = vsyncpa [#allocation4], 0  ;;  %s12_s8 = sshll.u32 %s375_s0, 4  ;;  %s294_s9 = smov [#allocation2]   ;;  %s13_s8 = int_to_ptr.hbm [resolvable:$true] %s12_s8 }
   0x2   :  { %s14_s10 = sshll.u32 %s294_s9, 4  ;;  %s295_s11 = smov 128   ;;  %s15_s10 = int_to_ptr.vmem [resolvable:$true] %s14_s10 }
   0x3   :  { %s296_s12 = smov 8  }
   0x4   :  { %20 = dma.hbm_to_vmem [thread:$0]  %s13_s8, 2048, %s15_s10, [#allocation3], %s295_s11, %s295_s11, %s296_s12  }
   0x5   :  { %290 = dma.done.wait [#allocation3], 2048  }
   0x6   :  { %291 = vsyncadd [#allocation3], 4294965248  ;;  %v25_v0 = vld [vmem:[#allocation2] sm:$0xff]  ;;  %v26_v1 = vld [vmem:[#allocation2 + $0x8] sm:$0xff]  ;;  %vm153_vm1 = vcmask 130048   ;;  %v297_v15 = vmov 0.0  }
   0x7   :  { %v27_v2 = vld [vmem:[#allocation2 + $0x10] sm:$0xff]  ;;  %v41_v3 = vmul.f32 30.0, %v25_v0  ;;  %v42_v4 = vmul.f32 30.0, %v26_v1  ;;  %v28_v5 = vld [vmem:[#allocation2 + $0x18] sm:$0xff]  ;;  %v29_v6 = vld [vmem:[#allocation2 + $0x20] sm:$0xff]  ;;  %vm89_vm0 = vcmp.gt.f32.partialorder %v25_v0, 0.0 }
   0x8   :  { %v43_v7 = vmul.f32 30.0, %v27_v2  ;;  %v44_v10 = vmul.f32 30.0, %v28_v5  ;;  %v30_v11 = vld [vmem:[#allocation2 + $0x28] sm:$0xff]  ;;  %vm90_vm2 = vcmp.gt.f32.partialorder %v26_v1, 0.0  ;;  %vm91_vm3 = vcmp.gt.f32.partialorder %v27_v2, 0.0  ;;  %v31_v14 = vld [vmem:[#allocation2 + $0x30] sm:$0xff] }
   0x9   :  { %v57_v8 = vmul.f32 1.442695, %v41_v3  ;;  %v59_v9 = vmul.f32 1.442695, %v42_v4  ;;  %v45_v13 = vmul.f32 30.0, %v29_v6  ;;  %v189_v16 = vsel %vm89_vm0, 1.0, %v297_v15 }
   0xa   :  { %v61_v12 = vmul.f32 1.442695, %v43_v7  ;;  %v63_v17 = vmul.f32 1.442695, %v44_v10  ;;  %vm92_vm4 = vcmp.gt.f32.partialorder %v28_v5, 0.0  ;;  %v32_v18 = vld [vmem:[#allocation2 + $0x38] sm:$0xff] }
   0xb   :  { %210 = vpow2.f32 %v57_v8  ;;  %v65_v19 = vmul.f32 1.442695, %v45_v13  ;;  %vm93_vm5 = vcmp.gt.f32.partialorder %v29_v6, 0.0  ;;  %v46_v20 = vmul.f32 30.0, %v30_v11  ;;  %v33_v21 = vld [vmem:[#allocation2 + $0x40] sm:$0xff]  ;;  %v321_v28 = vld [vmem:[#allocation2 + $0x48] sm:$0xff] }
   0xc   :  { %212 = vpow2.f32 %v59_v9  ;;  %v190_v22 = vsel %vm90_vm2, 1.0, %v297_v15  ;;  %v191_v23 = vsel %vm91_vm3, 1.0, %v297_v15  ;;  %v47_v24 = vmul.f32 30.0, %v31_v14  ;;  %v324_v32 = vld [vmem:[#allocation2 + $0x50] sm:$0xff]  ;;  %v36_v37 = vld [vmem:[#allocation2 + $0x58] sm:$0xff]  ;;  %v330_v45 = vld [vmem:[#allocation2 + $0x60] sm:$0xff] }
   0xd   :  { %214 = vpow2.f32 %v61_v12  ;;  %v192_v25 = vsel %vm92_vm4, 1.0, %v297_v15  ;;  %v67_v26 = vmul.f32 1.442695, %v46_v20  ;;  %v48_v27 = vmul.f32 30.0, %v32_v18  ;;  %v38_v51 = vld [vmem:[#allocation2 + $0x68] sm:$0xff]  ;;  %v39_v63 = vld [vmem:[#allocation2 + $0x70] sm:$0xff] }
   0xe   :  { %216 = vpow2.f32 %v63_v17  ;;  %v193_v29 = vsel %vm93_vm5, 1.0, %v297_v15  ;;  %v69_v30 = vmul.f32 1.442695, %v47_v24  ;;  %v49_v31 = vmul.f32 30.0, %v33_v21  ;;  %v40_v0 = vld [vmem:[#allocation2 + $0x78] sm:$0xff]  ;;  %s298_s0 = smov [#allocation5]  }
   0xf   :  { %218 = vpow2.f32 %v65_v19  ;;  %vm94_vm6 = vcmp.gt.f32.partialorder %v30_v11, 0.0  ;;  %vm95_vm7 = vcmp.gt.f32.partialorder %v31_v14, 0.0  ;;  %v71_v33 = vmul.f32 1.442695, %v48_v27  ;;  %s174_s13 = sshll.u32 %s298_s0, 4  ;;  %s176_s16 = sshll.u32 %s376_s1, 4  ;;  %s175_s13 = int_to_ptr.vmem [resolvable:$true] %s174_s13  ;;  %s177_s16 = int_to_ptr.hbm [resolvable:$true] %s176_s16 }
  0x10   :  { %220 = vpow2.f32 %v67_v26  ;;  %vm96_vm8 = vcmp.gt.f32.partialorder %v32_v18, 0.0  ;;  %v73_v35 = vmul.f32 1.442695, %v49_v31  ;;  %v50_v36 = vmul.f32 30.0, %v321_v28 }
  0x11   :  { %v211_v34 = vpop.eup %210  ;;  %222 = vpow2.f32 %v69_v30  ;;  %vm97_vm9 = vcmp.gt.f32.partialorder %v33_v21, 0.0  ;;  %v51_v40 = vmul.f32 30.0, %v324_v32  ;;  %v194_v43 = vsel %vm94_vm6, 1.0, %v297_v15 }
  0x12   :  { %v213_v38 = vpop.eup %212  ;;  %v137_v39 = vmul.f32 %v211_v34, %v189_v16  ;;  %224 = vpow2.f32 %v71_v33  ;;  %v75_v44 = vmul.f32 1.442695, %v50_v36  ;;  %v195_v48 = vsel %vm95_vm7, 1.0, %v297_v15 }
  0x13   :  { %v215_v41 = vpop.eup %214  ;;  %v138_v42 = vmul.f32 %v213_v38, %v190_v22  ;;  %226 = vpow2.f32 %v73_v35  ;;  %v77_v49 = vmul.f32 1.442695, %v51_v40  ;;  %v52_v50 = vmul.f32 30.0, %v36_v37 }
  0x14   :  { %v217_v46 = vpop.eup %216  ;;  %154 = vst.msk [vmem:[#allocation5] sm:$0xff] %vm153_vm1, %v137_v39  ;;  %v139_v47 = vmul.f32 %v215_v41, %v191_v23  ;;  %v196_v54 = vsel %vm96_vm8, 1.0, %v297_v15  ;;  %v197_v55 = vsel %vm97_vm9, 1.0, %v297_v15  ;;  %228 = vpow2.f32 %v75_v44 }
  0x15   :  { %v219_v52 = vpop.eup %218  ;;  %155 = vst.msk [vmem:[#allocation5 + $0x8] sm:$0xff] %vm153_vm1, %v138_v42  ;;  %v140_v53 = vmul.f32 %v217_v46, %v192_v25  ;;  %vm98_vm10 = vcmp.gt.f32.partialorder %v321_v28, 0.0  ;;  %230 = vpow2.f32 %v77_v49  ;;  %v79_v58 = vmul.f32 1.442695, %v52_v50 }
  0x16   :  { %v221_v56 = vpop.eup %220  ;;  %156 = vst.msk [vmem:[#allocation5 + $0x10] sm:$0xff] %vm153_vm1, %v139_v47  ;;  %v141_v57 = vmul.f32 %v219_v52, %v193_v29  ;;  %vm99_vm11 = vcmp.gt.f32.partialorder %v324_v32, 0.0  ;;  %v53_v61 = vmul.f32 30.0, %v330_v45  ;;  %v54_v62 = vmul.f32 30.0, %v38_v51 }
  0x17   :  { %v223_v59 = vpop.eup %222  ;;  %157 = vst.msk [vmem:[#allocation5 + $0x18] sm:$0xff] %vm153_vm1, %v140_v53  ;;  %v142_v60 = vmul.f32 %v221_v56, %v194_v43  ;;  %232 = vpow2.f32 %v79_v58  ;;  %vm100_vm12 = vcmp.gt.f32.partialorder %v36_v37, 0.0  ;;  %v198_v5 = vsel %vm98_vm10, 1.0, %v297_v15 }
  0x18   :  { %v225_v1 = vpop.eup %224  ;;  %158 = vst.msk [vmem:[#allocation5 + $0x20] sm:$0xff] %vm153_vm1, %v141_v57  ;;  %v143_v2 = vmul.f32 %v223_v59, %v195_v48  ;;  %v81_v6 = vmul.f32 1.442695, %v53_v61  ;;  %v83_v7 = vmul.f32 1.442695, %v54_v62  ;;  %v199_v9 = vsel %vm99_vm11, 1.0, %v297_v15 }
  0x19   :  { %v227_v3 = vpop.eup %226  ;;  %159 = vst.msk [vmem:[#allocation5 + $0x28] sm:$0xff] %vm153_vm1, %v142_v60  ;;  %v144_v4 = vmul.f32 %v225_v1, %v196_v54  ;;  %v55_v10 = vmul.f32 30.0, %v39_v63  ;;  %v56_v11 = vmul.f32 30.0, %v40_v0  ;;  %v200_v13 = vsel %vm100_vm12, 1.0, %v297_v15 }
  0x1a   :  { %160 = vst.msk [vmem:[#allocation5 + $0x30] sm:$0xff] %vm153_vm1, %v143_v2  ;;  %v145_v8 = vmul.f32 %v227_v3, %v197_v55  ;;  %v229_v12 = vpop.eup %228  ;;  %234 = vpow2.f32 %v81_v6  ;;  %vm101_vm13 = vcmp.gt.f32.partialorder %v330_v45, 0.0  ;;  %vm102_vm14 = vcmp.gt.f32.partialorder %v38_v51, 0.0 }
  0x1b   :  { %161 = vst.msk [vmem:[#allocation5 + $0x38] sm:$0xff] %vm153_vm1, %v144_v4  ;;  %v231_v14 = vpop.eup %230  ;;  %v146_v16 = vmul.f32 %v229_v12, %v198_v5  ;;  %236 = vpow2.f32 %v83_v7  ;;  %v85_v17 = vmul.f32 1.442695, %v55_v10  ;;  %v87_v18 = vmul.f32 1.442695, %v56_v11 }
  0x1c   :  { %162 = vst.msk [vmem:[#allocation5 + $0x40] sm:$0xff] %vm153_vm1, %v145_v8  ;;  %v147_v19 = vmul.f32 %v231_v14, %v199_v9  ;;  %v201_v22 = vsel %vm101_vm13, 1.0, %v297_v15  ;;  %vm103_vm15 = vcmp.gt.f32.partialorder %v39_v63, 0.0  ;;  %v202_v23 = vsel %vm102_vm14, 1.0, %v297_v15 }
  0x1d   :  { %v233_v20 = vpop.eup %232  ;;  %163 = vst.msk [vmem:[#allocation5 + $0x48] sm:$0xff] %vm153_vm1, %v146_v16  ;;  %238 = vpow2.f32 %v85_v17  ;;  %vm104_vm0 = vcmp.gt.f32.partialorder %v40_v0, 0.0  ;;  %v203_v27 = vsel %vm103_vm15, 1.0, %v297_v15 }
  0x1e   :  { %164 = vst.msk [vmem:[#allocation5 + $0x50] sm:$0xff] %vm153_vm1, %v147_v19  ;;  %v148_v21 = vmul.f32 %v233_v20, %v200_v13  ;;  %240 = vpow2.f32 %v87_v18  ;;  %v204_v29 = vsel %vm104_vm0, 1.0, %v297_v15 }
  0x20   :  { %v235_v24 = vpop.eup %234  ;;  %165 = vst.msk [vmem:[#allocation5 + $0x58] sm:$0xff] %vm153_vm1, %v148_v21 }
  0x21   :  { %v237_v25 = vpop.eup %236  ;;  %v149_v26 = vmul.f32 %v235_v24, %v201_v22 }
  0x22   :  { %v150_v28 = vmul.f32 %v237_v25, %v202_v23 }
  0x23   :  { %v239_v30 = vpop.eup %238  ;;  %166 = vst.msk [vmem:[#allocation5 + $0x60] sm:$0xff] %vm153_vm1, %v149_v26 }
  0x24   :  { %v241_v31 = vpop.eup %240  ;;  %167 = vst.msk [vmem:[#allocation5 + $0x68] sm:$0xff] %vm153_vm1, %v150_v28  ;;  %v151_v32 = vmul.f32 %v239_v30, %v203_v27 }
  0x25   :  { %v152_v33 = vmul.f32 %v241_v31, %v204_v29 }
  0x26   :  { %168 = vst.msk [vmem:[#allocation5 + $0x70] sm:$0xff] %vm153_vm1, %v151_v32 }
  0x27   :  { %169 = vst.msk [vmem:[#allocation5 + $0x78] sm:$0xff] %vm153_vm1, %v152_v33 }
  0x28   :  { %182 = dma.vmem_to_hbm [thread:$0]  %s175_s13, 2048, %s177_s16, [#allocation4], %s295_s11, %s295_s11, %s296_s12  }
  0x29   :  { %292 = dma.done.wait [#allocation4], 2048  }
  0x2a   :  { %293 = vsyncadd [#allocation4], 4294965248 }
  0x2b   :  { %187 = vsyncpa [#allocation3], 1 }
  0x2c   :  { %188 = vsyncpa [#allocation4], 1 }

</bundles_post_ra>
